<compile_context>
chip_gen: v7x
topology: tpu7x:2x2x1
jax: 0.10.0
libtpu: 0.0.40
codegen_flags: <defaults>
</compile_context>

<pallas_src>
import math
from functools import partial

import numpy as np
import jax
import jax.numpy as jnp
from jax.experimental import pallas as pl
from jax.experimental.pallas import tpu as pltpu


# ----------------------------------------------------------------------------
# Deterministic construction of the Fock-space unitaries (host-side glue).
# ----------------------------------------------------------------------------
def fock_basis(n, m):
    """All occupation tuples of m modes with n photons, deterministic order."""
    if m == 1:
        return [(n,)]
    out = []
    for k in range(n, -1, -1):
        for rest in fock_basis(n - k, m - 1):
            out.append((k,) + rest)
    return out


def photon_hamiltonian_np(h_single, n):
    """Second-quantized image of an m x m single-photon Hamiltonian on the
    n-photon Fock space:  H_fock[i, j] = <i| sum_pq h[p,q] a_p^dag a_q |j>."""
    m = h_single.shape[0]
    basis = fock_basis(n, m)
    index = {b: i for i, b in enumerate(basis)}
    D = len(basis)
    H = np.zeros((D, D), dtype=np.float64)
    for j, occ in enumerate(basis):
        for p in range(m):
            for q in range(m):
                hpq = h_single[p, q]
                if hpq == 0.0:
                    continue
                if p == q:
                    H[j, j] += hpq * occ[q]
                else:
                    if occ[q] == 0:
                        continue
                    new = list(occ)
                    new[q] -= 1
                    new[p] += 1
                    i = index[tuple(new)]
                    H[i, j] += hpq * math.sqrt((occ[p] + 1) * occ[q])
    return H, basis


def build_swap_fock_parts(n, m, m1, m2):
    """Returns (U_BS float32 (D, D), signs float32 (D,)) where
    U_PS = diag(signs) and forward = diag(signs) @ (U_BS @ x)."""
    # Single-photon beamsplitter Hamiltonian (antisymmetric).
    h = np.zeros((m, m), dtype=np.float64)
    h[m1, m2] = -1.0
    h[m2, m1] = +1.0
    H_fock, basis = photon_hamiltonian_np(h, n)
    H_fock = H_fock.astype(np.float32)

    # U_BS = expm(-pi/2 * H_fock), computed in float32 like torch.matrix_exp.
    U_BS = np.asarray(
        jax.scipy.linalg.expm(jnp.asarray(-H_fock * (np.pi / 2), jnp.float32))
    ).astype(np.float32)

    # Phase flip (shift = pi) on mode m2 lifted to Fock space: diag((-1)^occ[m2]).
    signs = np.array([(-1.0) ** occ[m2] for occ in basis], dtype=np.float32)
    return U_BS, signs


def _round_up(x, mult):
    return ((x + mult - 1) // mult) * mult


# ----------------------------------------------------------------------------
# Pallas kernels.
# ----------------------------------------------------------------------------
def _matmul_kernel_tiled(u_ref, x_ref, o_ref, acc_ref):
    """Standard 3-axis tiled matmul body with an f32 VMEM accumulator."""
    @pl.when(pl.program_id(2) == 0)
    def _():
        acc_ref[...] = jnp.zeros_like(acc_ref)

    acc_ref[...] += jnp.dot(
        u_ref[...], x_ref[...], preferred_element_type=jnp.float32
    )

    @pl.when(pl.program_id(2) == pl.num_programs(2) - 1)
    def _():
        o_ref[...] = acc_ref[...].astype(o_ref.dtype)


def _matmul_tiled(u, x, *, tm, tn, tk):
    """u: (M, K), x: (K, N); all dims are already multiples of the tiles."""
    M, K = u.shape
    _, N = x.shape
    grid = (M // tm, N // tn, K // tk)
    itemsize = np.dtype(u.dtype).itemsize
    # Operand re-reads under the 3-axis grid: u streamed N//tn times,
    # x streamed M//tm times, output written once.
    cost = pl.CostEstimate(
        flops=2 * M * N * K,
        transcendentals=0,
        bytes_accessed=int(
            itemsize * (M * K * (N // tn) + K * N * (M // tm)) + 4 * M * N
        ),
    )
    return pl.pallas_call(
        _matmul_kernel_tiled,
        out_shape=jax.ShapeDtypeStruct((M, N), jnp.float32),
        grid_spec=pltpu.PrefetchScalarGridSpec(
            num_scalar_prefetch=0,
            grid=grid,
            in_specs=[
                pl.BlockSpec((tm, tk), lambda i, j, k: (i, k)),
                pl.BlockSpec((tk, tn), lambda i, j, k: (k, j)),
            ],
            out_specs=pl.BlockSpec((tm, tn), lambda i, j, k: (i, j)),
            scratch_shapes=[pltpu.VMEM((tm, tn), jnp.float32)],
        ),
        compiler_params=pltpu.CompilerParams(
            dimension_semantics=("parallel", "parallel", "arbitrary"),
            # Tile budget above stays <= ~12 MiB (double buffered), so 48 MiB
            # is ample on v5e/v6e (128 MiB) and safely under v7x's 64 MiB.
            vmem_limit_bytes=48 * 1024 * 1024,
        ),
        cost_estimate=cost,
    )(u, x)


def _matmul_kernel_single(u_ref, x_ref, o_ref):
    """Whole-problem single-block matmul for small D (no grid, no accumulator)."""
    o_ref[...] = jnp.dot(
        u_ref[...], x_ref[...], preferred_element_type=jnp.float32
    ).astype(o_ref.dtype)


def _matmul_single(u, x):
    M, _ = u.shape
    _, N = x.shape
    return pl.pallas_call(
        _matmul_kernel_single,
        out_shape=jax.ShapeDtypeStruct((M, N), jnp.float32),
    )(u, x)


# ----------------------------------------------------------------------------
# Jitted forward wrappers (pad x only when needed; u is pre-padded host-side).
# ----------------------------------------------------------------------------
@partial(jax.jit, static_argnames=("D", "K", "trim"))
def _forward_small(u_p, x, *, D, K, trim):
    Kp = u_p.shape[1]
    Np = _round_up(K, 128)
    if (D, K) != (Kp, Np):
        x_p = jnp.zeros((Kp, Np), u_p.dtype).at[:D, :K].set(x.astype(u_p.dtype))
    else:
        x_p = x.astype(u_p.dtype)
    out_p = _matmul_single(u_p, x_p)
    return out_p[:D, :K] if trim else out_p


@partial(jax.jit, static_argnames=("tm", "tn", "tk", "D", "K", "trim"))
def _forward_tiled(u_p, x, *, tm, tn, tk, D, K, trim):
    Kp = u_p.shape[1]
    Np = _round_up(K, tn)
    if (D, K) != (Kp, Np):
        x_p = jnp.zeros((Kp, Np), u_p.dtype).at[:D, :K].set(x.astype(u_p.dtype))
    else:
        x_p = x.astype(u_p.dtype)
    out_p = _matmul_tiled(u_p, x_p, tm=tm, tn=tn, tk=tk)
    return out_p[:D, :K] if trim else out_p


# ----------------------------------------------------------------------------
# Module-style wrapper (mirrors the PyTorch SWAP_Fock_unitary).
# ----------------------------------------------------------------------------
class SWAPFockUnitary:
    """forward(matrix) = U_PS @ (U_BS @ matrix) with U_PS = diag(+-1) folded
    exactly into U_BS, computed as a single Pallas matmul on TPU."""

    # Problems with D at/below this use the single-block path: padding the
    # shipped 10x10 config to 128^3 tiles would be ~2000x wasted MXU work.
    _SMALL_D = 256

    def __init__(self, n, m, m1, m2, *, use_bf16=False):
        U_BS, signs = build_swap_fock_parts(n, m, m1, m2)
        self.D = int(U_BS.shape[0])
        D = self.D
        u_fused = signs[:, None] * U_BS  # exact: rows scaled by +/-1
        self.use_bf16 = bool(use_bf16)
        dtype = jnp.bfloat16 if use_bf16 else jnp.float32
        # NOTE: bf16 operands (f32 accumulate) give ~3x MXU throughput on
        # v6e/v7x and halve HBM/VMEM traffic, but will NOT meet a 1e-5
        # tolerance; default stays f32.

        if D <= self._SMALL_D:
            self.small = True
            self.tm = self.tk = None
            Mp = _round_up(D, 8)
            Kp = _round_up(D, 128)
        else:
            self.small = False
            # 256-multiple tiles (fill the 2x256^2 MXU on v6e/v7x), sized
            # adaptively so the reduction dim is not padded far past D.
            self.tm = min(512, _round_up(D, 256))
            self.tk = min(1024, _round_up(D, 256))
            Mp = _round_up(D, self.tm)
            Kp = _round_up(D, self.tk)

        # Pre-pad the module constant ONCE host-side (not per call under jit).
        u_p = np.zeros((Mp, Kp), np.float32)
        u_p[:D, :D] = u_fused
        self.u_padded = jnp.asarray(u_p, dtype=dtype)
        self.Mp, self.Kp = Mp, Kp

    def _pick_tn(self, K):
        tn = min(512, _round_up(K, 256))
        Np = _round_up(K, tn)
        # v7x has 2 TensorCores: avoid collapsing to a (1, 1, k) grid when the
        # N axis can be cheaply split instead.
        if (self.Mp // self.tm) == 1 and (Np // tn) == 1 and tn > 256:
            tn = 256
        return tn

    def __call__(self, x, *, trim=True):
        """x: (D, K) float32.  trim=False keeps the padded (Mp, Np) result for
        chained SWAP_Fock applications (skip the per-stage trim/re-pad)."""
        D = self.D
        K = int(x.shape[1])
        if self.small:
            return _forward_small(self.u_padded, x, D=D, K=K, trim=trim)
        tn = self._pick_tn(K)
        return _forward_tiled(
            self.u_padded, x, tm=self.tm, tn=tn, tk=self.tk, D=D, K=K, trim=trim
        )


if __name__ == "__main__":
    # --- shipped configuration: n=2 photons, m=4 modes, beamsplitter (0, 1) ---
    # D = C(n+m-1, n) = C(5, 2) = 10  ->  small-problem single-block path.
    n, m, m1, m2 = 2, 4, 0, 1
    mod_small = SWAPFockUnitary(n, m, m1, m2)
    D = mod_small.D

    key = jax.random.PRNGKey(0)
    x = jax.random.normal(key, (D, D), dtype=jnp.float32)

    out = jax.block_until_ready(mod_small(x))

    # Pure-JAX reference of the original (unfused) forward pass:
    #   U_PS @ (U_BS @ x)  with  U_PS = diag(signs).
    U_BS_np, signs_np = build_swap_fock_parts(n, m, m1, m2)
    ref = jnp.asarray(signs_np)[:, None] * (jnp.asarray(U_BS_np) @ x)
    assert out.shape == (D, D)
    np.testing.assert_allclose(np.asarray(out), np.asarray(ref), rtol=1e-5, atol=1e-5)

    # --- larger configuration exercising the tiled MXU path ---
    # n=4 photons, m=8 modes -> D = C(11, 4) = 330 > 256 (still small & fast).
    nb, mb = 4, 8
    mod_big = SWAPFockUnitary(nb, mb, 0, 1)
    Db = mod_big.D
    Kb = 48
    xb = jax.random.normal(jax.random.PRNGKey(0), (Db, Kb), dtype=jnp.float32)

    outb = jax.block_until_ready(mod_big(xb))

    U_BSb, signsb = build_swap_fock_parts(nb, mb, 0, 1)
    refb = (signsb[:, None] * U_BSb).astype(np.float64) @ np.asarray(xb, np.float64)
    assert outb.shape == (Db, Kb)
    # Relaxed tolerance vs. a float64 reference: the f32 MXU path accumulates
    # over 330 reduction terms.
    np.testing.assert_allclose(np.asarray(outb, np.float64), refb, rtol=5e-4, atol=5e-4)

    # TODO(synk): for very large D in throughput-critical pipelines, construct
    # the module with use_bf16=True (re-validate with a relaxed tolerance) and
    # chain calls with trim=False to avoid per-stage pad/trim HBM passes.
    print("KERNEL_OK")
</pallas_src>

<mosaic_0001>
module attributes {stable_mosaic.version = 11 : i64} {
  func.func @_matmul_kernel_single(%arg0: memref<16x128xf32, #tpu.memory_space<vmem>>, %arg1: memref<128x128xf32, #tpu.memory_space<vmem>>, %arg2: memref<16x128xf32, #tpu.memory_space<vmem>>) attributes {dimension_semantics = [], scalar_prefetch = 0 : i64, scratch_operands = 0 : i64, tpu.core_type = #tpu.core_type<tc>} {
    %c0 = arith.constant 0 : index
    %c0_0 = arith.constant 0 : index
    %0 = vector.load %arg0[%c0, %c0_0] : memref<16x128xf32, #tpu.memory_space<vmem>>, vector<16x128xf32>
    %c0_1 = arith.constant 0 : index
    %c0_2 = arith.constant 0 : index
    %1 = vector.load %arg1[%c0_1, %c0_2] : memref<128x128xf32, #tpu.memory_space<vmem>>, vector<128x128xf32>
    %cst = arith.constant dense<0.000000e+00> : vector<16x128xf32>
    %2 = tpu.matmul %0, %1, %cst {dimension_numbers = #tpu.dot_dimension_numbers<[1], [0], [0], [1], [0, 0, 1, 1], [], []>} : vector<16x128xf32>, vector<128x128xf32>, vector<16x128xf32> -> vector<16x128xf32>
    %c0_3 = arith.constant 0 : index
    %c0_4 = arith.constant 0 : index
    %3 = vector.load %arg2[%c0_3, %c0_4] : memref<16x128xf32, #tpu.memory_space<vmem>>, vector<16x128xf32>
    tpu.vector_store %arg2[%c0_3, %c0_4], %2 {strides = array<i32>} : memref<16x128xf32, #tpu.memory_space<vmem>>, vector<16x128xf32>,
    return
  }
}

</mosaic_0001>

<bundles_post_ra>
// kernel: _forward_small.1
= control target key start
LH: loop header
LB: loop body
LE: loop exit
PB: predicated region body
PF: predicated region fallthrough
CT: control target
= control target key end

     0   :  { %s319_s0 = inlined_call_operand.vmem [shape: f32[16,128], index: 0, kind: input, shape index: {}]   ;;  %s320_s1 = inlined_call_operand.vmem [shape: f32[128,128], index: 1, kind: input, shape index: {}]   ;;  %s321_s2 = inlined_call_operand.hbm [shape: f32[16,128], index: 2, kind: output, shape index: {}]  }
   0x1   :  { %v14_v0 = vld [vmem:[%s320_s1] sm:$0xff]  ;;  %v15_v1 = vld [vmem:[%s320_s1 + $0x8] sm:$0xff]  ;;  %v16_v2 = vld [vmem:[%s320_s1 + $0x10] sm:$0xff] }
   0x2   :  { %v176_v3 = vpack.c.bf16 %v15_v1, %v14_v0  ;;  %v17_v4 = vld [vmem:[%s320_s1 + $0x18] sm:$0xff]  ;;  %v18_v6 = vld [vmem:[%s320_s1 + $0x20] sm:$0xff]  ;;  %v19_v7 = vld [vmem:[%s320_s1 + $0x28] sm:$0xff] }
   0x3   :  { %v180_v5 = vpack.c.bf16 %v17_v4, %v16_v2  ;;  %v184_v8 = vpack.c.bf16 %v19_v7, %v18_v6  ;;  %v12_v9 = vld [vmem:[%s319_s0] sm:$0xff]  ;;  %v20_v10 = vld [vmem:[%s320_s1 + $0x30] sm:$0xff]  ;;  %v21_v11 = vld [vmem:[%s320_s1 + $0x38] sm:$0xff] }
   0x4   :  { %177 = vmatprep.subr.bf16.mxu0 %v176_v3  ;;  %173 = vmatprep.mubr.f32.mxu0 %v12_v9 }
   0x5   :  { %179 = vmatpush3.bf16.msra.mxu0 %v176_v3 }
   0x6   :  { %181 = vmatprep.subr.bf16.mxu0 %v180_v5 }
   0x7   :  { %7 = vsyncpa [#allocation3], 0  ;;  %v188_v12 = vpack.c.bf16 %v21_v11, %v20_v10  ;;  %v22_v13 = vld [vmem:[%s320_s1 + $0x40] sm:$0xff]  ;;  %v23_v14 = vld [vmem:[%s320_s1 + $0x48] sm:$0xff]  ;;  %s235_s17 = smov [#allocation2]  }
   0x8   :  { %v192_v15 = vpack.c.bf16 %v23_v14, %v22_v13  ;;  %v24_v16 = vld [vmem:[%s320_s1 + $0x50] sm:$0xff]  ;;  %v25_v17 = vld [vmem:[%s320_s1 + $0x58] sm:$0xff]  ;;  %v26_v19 = vld [vmem:[%s320_s1 + $0x60] sm:$0xff]  ;;  %s112_s18 = sshll.u32 %s235_s17, 4  ;;  %s113_s18 = int_to_ptr.vmem [resolvable:$true] %s112_s18 }
   0x9   :  { %183 = vmatpush3.bf16.msra.mxu0 %v180_v5  ;;  %v196_v18 = vpack.c.bf16 %v25_v17, %v24_v16  ;;  %v27_v20 = vld [vmem:[%s320_s1 + $0x68] sm:$0xff]  ;;  %v28_v22 = vld [vmem:[%s320_s1 + $0x70] sm:$0xff]  ;;  %v29_v23 = vld [vmem:[%s320_s1 + $0x78] sm:$0xff]  ;;  %s211_s19 = scalar_lea.vmem %s113_s18, 256  ;;  %p216_p1 = scmp.lt.s32.totalorder %s113_s18, %s113_s18 }
   0xa   :  { %185 = vmatprep.subr.bf16.mxu0 %v184_v8  ;;  %v200_v21 = vpack.c.bf16 %v27_v20, %v26_v19  ;;  %v204_v24 = vpack.c.bf16 %v29_v23, %v28_v22  ;;  %v13_v25 = vld [vmem:[%s319_s0 + $0x8] sm:$0xff]  ;;  %p212_p0 = scmp.ne.s32.totalorder %s113_s18, %s211_s19  ;;  %p217_p2 = scmp.lt.s32.totalorder %s211_s19, %s211_s19 }
   0xc   :  { %p218_p3 = por %p217_p2, %p216_p1 }
   0xd   :  { %187 = vmatpush3.bf16.msra.mxu0 %v184_v8 }
   0xe   :  { %189 = vmatprep.subr.bf16.mxu0 %v188_v12  ;;  %p219_p4 = pnand %p218_p3, %p212_p0 }
  0x11   :  { %191 = vmatpush3.bf16.msra.mxu0 %v188_v12 }
  0x12   :  { %193 = vmatprep.subr.bf16.mxu0 %v192_v15 }
  0x15   :  { %195 = vmatpush3.bf16.msra.mxu0 %v192_v15 }
  0x16   :  { %197 = vmatprep.subr.bf16.mxu0 %v196_v18 }
  0x19   :  { %199 = vmatpush3.bf16.msra.mxu0 %v196_v18 }
  0x1a   :  { %201 = vmatprep.subr.bf16.mxu0 %v200_v21 }
  0x1d   :  { %203 = vmatpush3.bf16.msra.mxu0 %v200_v21 }
  0x1e   :  { %205 = vmatprep.subr.bf16.mxu0 %v204_v24 }
  0x21   :  { %207 = vmatpush3.bf16.msra.mxu0 %v204_v24 }
  0x24   :  { %174 = vmatmul.mubr.f32.vlgmr.msra.gmra.mrb[0].mxu0 %v13_v25 }
  0xf7   :  { %v175_v26 = vpop.f32.mrb[0].mxu0 }
  0xf8   :  { %106 = vst [vmem:[#allocation2 + $0x8] sm:$0xff] %v175_v26  ;;  %v96_v27 = vpop.f32.mrb[1].mxu0 }
  0xf9   :  { %105 = vst [vmem:[#allocation2] sm:$0xff] %v96_v27 }
  0xfa   :  { %222 = shalt.err (!%p219_p4)
}
  0xfb   :  { %s223_s21 = scalar_lea.hbm %s321_s2, 256 }
  0xfc   :  { %p224_p5 = scmp.ne.s32.totalorder %s321_s2, %s223_s21  ;;  %p227_p6 = scmp.lt.u32.totalorder %s223_s21, %s321_s2 }
  0xfe   :  { %p229_p7 = pnand %p227_p6, %p224_p5 }
 0x100   :  { %232 = shalt.err (!%p229_p7)
}
 0x101   :  { %s236_s25 = smov 128   ;;  %s237_s26 = smov 8  }
 0x102   :  { %118 = dma.vmem_to_hbm [thread:$0]  %s113_s18, 256, %s321_s2, [#allocation3], %s236_s25, %s236_s25, %s237_s26  }
 0x103   :  { %233 = dma.done.wait [#allocation3], 256  }
 0x104   :  { %234 = vsyncadd [#allocation3], 4294967040 }
 0x105   :  { %122 = vsyncpa [#allocation3], 1 }

</bundles_post_ra>
